<compile_context>
chip_gen: v6e
topology: v6e:2x2x1
jax: 0.10.0
libtpu: 0.0.40
codegen_flags: <defaults>
</compile_context>

<pallas_src>
import functools

import jax
import jax.numpy as jnp
from jax import lax
from jax.experimental import pallas as pl
from jax.experimental.pallas import tpu as pltpu

_MIB = 1024 * 1024


def _vmem_capacity_bytes():
    """Physical VMEM per core (128 MiB v5e/v6e, 64 MiB v7x); safe fallback."""
    try:
        return int(pltpu.get_tpu_info().vmem_capacity_bytes)
    except Exception:
        return 64 * _MIB  # v7x-safe fallback


def _matmul_operand(x, use_bf16_matmul):
    # Avoid an unconditional f32 upcast copy when the input is already f32.
    if use_bf16_matmul:
        return x.astype(jnp.bfloat16)
    if x.dtype == jnp.float32:
        return x
    return x.astype(jnp.float32)


def _softmax_rows(energy):
    """softmax(rowmax(E) - E) == exp(rowmin(E) - E) / rowsum (shift invariant)."""
    shifted = jnp.min(energy, axis=-1, keepdims=True) - energy
    ex = jnp.exp(shifted)
    # Exact reciprocal keeps the 1e-4/1e-5 tolerances; approx=True (EUP vrcp)
    # is cheaper but loosens numerics -> validate before switching.
    return ex * pl.reciprocal(jnp.sum(ex, axis=-1, keepdims=True), approx=False)


# ----------------------------------------------------------------------------
# Fused (single-block) path: whole (Bt, C, N) slab per grid step.
# ----------------------------------------------------------------------------
def _cam_fused_kernel(gamma_ref, x_ref, o_ref, *, use_bf16_matmul):
    xm = _matmul_operand(x_ref[...], use_bf16_matmul)            # (Bt, C, N)
    energy = lax.dot_general(                                     # (Bt, C, C)
        xm, xm,
        dimension_numbers=(((2,), (2,)), ((0,), (0,))),
        preferred_element_type=jnp.float32)
    att = _softmax_rows(energy)
    if use_bf16_matmul:
        att = att.astype(jnp.bfloat16)
    out = lax.dot_general(                                        # (Bt, C, N)
        att, xm,
        dimension_numbers=(((2,), (1,)), ((0,), (0,))),
        preferred_element_type=jnp.float32)
    # Residual re-reads x_ref (no f32 copy held live across both matmuls).
    o_ref[...] = (gamma_ref[0] * out
                  + x_ref[...].astype(jnp.float32)).astype(o_ref.dtype)


def _fused_vmem_bytes(bt, C, N, itemsize):
    blk = bt * C * N
    return (2 * blk * itemsize        # double-buffered input block
            + 2 * blk * itemsize      # double-buffered output block
            + blk * 4                 # f32 'out' intermediate
            + 2 * bt * C * C * 4      # energy + attention
            + 1 * _MIB)               # headroom


def _choose_block_batch(B, C, N, itemsize, budget):
    """Pick how many batches to process per grid step (only useful for small C)."""
    if C >= 128:
        return 1
    best = 1
    for bt in range(1, B + 1):
        if B % bt:
            continue
        if bt * C > 1024:             # enough rows already; no need for more
            break
        if _fused_vmem_bytes(bt, C, N, itemsize) > budget:
            break
        best = bt
        if B >= 4 and bt * 2 >= B:    # keep >=2 parallel steps for v7x's 2 TCs
            break
    return best


def _cam_fused(x_flat, gamma, *, bt, vmem_cap, use_bf16_matmul):
    B, C, N = x_flat.shape
    itemsize = jnp.dtype(x_flat.dtype).itemsize
    est = _fused_vmem_bytes(bt, C, N, itemsize)
    limit = int(min(vmem_cap * 0.9, est + 16 * _MIB))
    return pl.pallas_call(
        functools.partial(_cam_fused_kernel, use_bf16_matmul=use_bf16_matmul),
        out_shape=jax.ShapeDtypeStruct((B, C, N), x_flat.dtype),
        grid_spec=pltpu.PrefetchScalarGridSpec(
            num_scalar_prefetch=0,
            grid=(B // bt,),
            in_specs=[
                pl.BlockSpec(memory_space=pltpu.SMEM),            # gamma (1,)
                pl.BlockSpec((bt, C, N), lambda b: (b, 0, 0)),
            ],
            out_specs=pl.BlockSpec((bt, C, N), lambda b: (b, 0, 0)),
        ),
        compiler_params=pltpu.CompilerParams(
            dimension_semantics=("parallel",),
            vmem_limit_bytes=limit,
        ),
    )(gamma, x_flat)


# ----------------------------------------------------------------------------
# Streamed two-pass path: X stays in HBM, streamed as (C, tn) lane tiles.
# ----------------------------------------------------------------------------
def _cam_energy_softmax_kernel(x_ref, att_ref, acc_ref, *, use_bf16_matmul):
    n = pl.program_id(1)

    @pl.when(n == 0)
    def _():
        acc_ref[...] = jnp.zeros_like(acc_ref)

    xm = _matmul_operand(x_ref[0], use_bf16_matmul)               # (C, tn)
    acc_ref[...] += lax.dot_general(
        xm, xm,
        dimension_numbers=(((1,), (1,)), ((), ())),
        preferred_element_type=jnp.float32)                       # (C, C)

    @pl.when(n == pl.num_programs(1) - 1)
    def _():
        att_ref[0] = _softmax_rows(acc_ref[...]).astype(att_ref.dtype)


def _cam_apply_kernel(gamma_ref, att_ref, x_ref, o_ref, *, use_bf16_matmul):
    xm = _matmul_operand(x_ref[0], use_bf16_matmul)               # (C, tn)
    att = att_ref[0]                                              # (C, C) f32
    if use_bf16_matmul:
        att = att.astype(jnp.bfloat16)
    out = jnp.dot(att, xm, preferred_element_type=jnp.float32)    # (C, tn)
    o_ref[0] = (gamma_ref[0] * out
                + x_ref[0].astype(jnp.float32)).astype(o_ref.dtype)


def _cam_streamed(x_flat, gamma, *, tn, vmem_cap, use_bf16_matmul):
    B, C, N = x_flat.shape
    itemsize = jnp.dtype(x_flat.dtype).itemsize
    if tn is None:
        tn = N
        for cand in (2048, 1024, 512, 256, 128):
            if N % cand == 0:
                tn = cand
                break
    assert N % tn == 0, "spatial tile must divide padded N"
    n_tiles = N // tn
    tile_bytes = C * tn * itemsize

    est1 = 2 * tile_bytes + 3 * C * C * 4 + 1 * _MIB
    attention = pl.pallas_call(
        functools.partial(_cam_energy_softmax_kernel,
                          use_bf16_matmul=use_bf16_matmul),
        out_shape=jax.ShapeDtypeStruct((B, C, C), jnp.float32),
        grid_spec=pltpu.PrefetchScalarGridSpec(
            num_scalar_prefetch=0,
            grid=(B, n_tiles),
            in_specs=[pl.BlockSpec((1, C, tn), lambda b, n: (b, 0, n))],
            out_specs=pl.BlockSpec((1, C, C), lambda b, n: (b, 0, 0)),
            scratch_shapes=[pltpu.VMEM((C, C), jnp.float32)],
        ),
        compiler_params=pltpu.CompilerParams(
            dimension_semantics=("parallel", "arbitrary"),
            vmem_limit_bytes=int(min(vmem_cap * 0.9, est1 + 16 * _MIB)),
        ),
    )(x_flat)

    est2 = 4 * tile_bytes + 2 * C * C * 4 + C * tn * 4 + 1 * _MIB
    out_flat = pl.pallas_call(
        functools.partial(_cam_apply_kernel, use_bf16_matmul=use_bf16_matmul),
        out_shape=jax.ShapeDtypeStruct((B, C, N), x_flat.dtype),
        grid_spec=pltpu.PrefetchScalarGridSpec(
            num_scalar_prefetch=0,
            grid=(B, n_tiles),
            in_specs=[
                pl.BlockSpec(memory_space=pltpu.SMEM),            # gamma (1,)
                pl.BlockSpec((1, C, C), lambda b, n: (b, 0, 0)),
                pl.BlockSpec((1, C, tn), lambda b, n: (b, 0, n)),
            ],
            out_specs=pl.BlockSpec((1, C, tn), lambda b, n: (b, 0, n)),
        ),
        compiler_params=pltpu.CompilerParams(
            dimension_semantics=("parallel", "parallel"),
            vmem_limit_bytes=int(min(vmem_cap * 0.9, est2 + 16 * _MIB)),
        ),
    )(gamma, attention, x_flat)
    return out_flat


# ----------------------------------------------------------------------------
# Public wrapper
# ----------------------------------------------------------------------------
def cam_module_forward(x, gamma, *, force_stream=False, tn=None,
                       use_bf16_matmul=False):
    """x: (B, C, H, W), gamma: (1,).  Matches CAM_Module.forward."""
    B, C, H, W = x.shape
    N = H * W
    x_flat = x.reshape(B, C, N)

    # Lane alignment: pad N to a multiple of 128.  Zero columns contribute
    # nothing to X @ X^T and the padded output columns are sliced off, so the
    # result is exact while stores stay lane-dense (no masked vst).
    n_pad = (-N) % 128
    if n_pad:
        x_flat = jnp.pad(x_flat, ((0, 0), (0, 0), (0, n_pad)))
    Np = N + n_pad

    vmem_cap = _vmem_capacity_bytes()
    budget = vmem_cap // 2            # stay well clear of physical VMEM
    itemsize = jnp.dtype(x_flat.dtype).itemsize
    bt = _choose_block_batch(B, C, Np, itemsize, budget)

    if force_stream or _fused_vmem_bytes(bt, C, Np, itemsize) > budget:
        out_flat = _cam_streamed(x_flat, gamma, tn=tn, vmem_cap=vmem_cap,
                                 use_bf16_matmul=use_bf16_matmul)
    else:
        out_flat = _cam_fused(x_flat, gamma, bt=bt, vmem_cap=vmem_cap,
                              use_bf16_matmul=use_bf16_matmul)

    if n_pad:
        out_flat = out_flat[:, :, :N]
    return out_flat.reshape(B, C, H, W)


def cam_module_ref(x, gamma):
    """Pure-JAX reference matching the PyTorch forward exactly."""
    B, C, H, W = x.shape
    xf = x.reshape(B, C, H * W)
    energy = jnp.einsum("bcn,bdn->bcd", xf, xf)
    energy_new = jnp.max(energy, axis=-1, keepdims=True) - energy
    attention = jax.nn.softmax(energy_new, axis=-1)
    out = jnp.einsum("bcd,bdn->bcn", attention, xf).reshape(B, C, H, W)
    return gamma[0] * out + x


if __name__ == "__main__":
    key = jax.random.PRNGKey(0)
    B, C, H, W = 2, 4, 16, 16
    x = jax.random.normal(key, (B, C, H, W), dtype=jnp.float32)

    gamma0 = jnp.zeros((1,), dtype=jnp.float32)   # module init: gamma = zeros(1)
    gamma1 = jnp.array([0.5], dtype=jnp.float32)

    # fused path, gamma == 0 (default init) -> output must equal x exactly
    y = cam_module_forward(x, gamma0)
    jax.block_until_ready(y)
    assert jnp.allclose(y, cam_module_ref(x, gamma0), atol=1e-5, rtol=1e-5), \
        "mismatch vs reference (fused, gamma=0)"

    # fused path, nonzero gamma
    y1 = cam_module_forward(x, gamma1)
    jax.block_until_ready(y1)
    assert jnp.allclose(y1, cam_module_ref(x, gamma1), atol=1e-4, rtol=1e-4), \
        "mismatch vs reference (fused, gamma!=0)"

    # streamed two-pass path, forced; tn=128 so the energy accumulator runs >1 step
    y2 = cam_module_forward(x, gamma1, force_stream=True, tn=128)
    jax.block_until_ready(y2)
    assert jnp.allclose(y2, cam_module_ref(x, gamma1), atol=1e-4, rtol=1e-4), \
        "mismatch vs reference (streamed)"

    # non lane-aligned spatial size exercises the zero-pad path (7*7=49 -> 128)
    x7 = jax.random.normal(jax.random.PRNGKey(1), (2, 4, 7, 7), dtype=jnp.float32)
    y3 = cam_module_forward(x7, gamma1)
    jax.block_until_ready(y3)
    assert jnp.allclose(y3, cam_module_ref(x7, gamma1), atol=1e-4, rtol=1e-4), \
        "mismatch vs reference (padded N)"

    print("KERNEL_OK")
</pallas_src>

<mosaic_0001>
module attributes {stable_mosaic.version = 11 : i64} {
  func.func @_cam_fused_kernel(%arg0: i32, %arg1: memref<1xf32, #tpu.memory_space<smem>>, %arg2: memref<2x4x256xf32, #tpu.memory_space<vmem>>, %arg3: memref<2x4x256xf32, #tpu.memory_space<vmem>>) attributes {dimension_semantics = [#tpu.dimension_semantics<parallel>], iteration_bounds = array<i64: 1>, scalar_prefetch = 0 : i64, scratch_operands = 0 : i64, tpu.core_type = #tpu.core_type<tc>, window_params = [{transform_indices = @transform_0, window_bounds = array<i64: 1>}, {transform_indices = @transform_1, window_bounds = array<i64: 2, 4, 256>}, {transform_indices = @transform_2, window_bounds = array<i64: 2, 4, 256>}]} {
    %c0 = arith.constant 0 : index
    %c0_0 = arith.constant 0 : index
    %c0_1 = arith.constant 0 : index
    %0 = vector.load %arg2[%c0, %c0_0, %c0_1] : memref<2x4x256xf32, #tpu.memory_space<vmem>>, vector<2x4x256xf32>
    %cst = arith.constant dense<0.000000e+00> : vector<2x4x4xf32>
    %1 = tpu.matmul %0, %0, %cst {dimension_numbers = #tpu.dot_dimension_numbers<[2], [2], [1], [1], [0, 0, 0, 1, 1, 1], [0], [0]>} : vector<2x4x256xf32>, vector<2x4x256xf32>, vector<2x4x4xf32> -> vector<2x4x4xf32>
    %cst_2 = arith.constant dense<0x7F800000> : vector<2x4xf32>
    %2 = vector.multi_reduction <minimumf>, %1, %cst_2 [2] : vector<2x4x4xf32> to vector<2x4xf32>
    %3 = vector.shape_cast %2 : vector<2x4xf32> to vector<2x4x1xf32>
    %4 = vector.broadcast %3 : vector<2x4x1xf32> to vector<2x4x4xf32>
    %5 = arith.subf %4, %1 : vector<2x4x4xf32>
    %6 = math.exp %5 : vector<2x4x4xf32>
    %cst_3 = arith.constant dense<0.000000e+00> : vector<2x4xf32>
    %7 = vector.multi_reduction <add>, %6, %cst_3 [2] : vector<2x4x4xf32> to vector<2x4xf32>
    %8 = vector.shape_cast %7 : vector<2x4xf32> to vector<2x4x1xf32>
    %9 = tpu.reciprocal %8 : vector<2x4x1xf32> -> vector<2x4x1xf32>
    %10 = vector.broadcast %9 : vector<2x4x1xf32> to vector<2x4x4xf32>
    %11 = arith.mulf %6, %10 : vector<2x4x4xf32>
    %cst_4 = arith.constant dense<0.000000e+00> : vector<2x4x256xf32>
    %12 = tpu.matmul %11, %0, %cst_4 {dimension_numbers = #tpu.dot_dimension_numbers<[2], [1], [1], [2], [0, 0, 0, 1, 1, 2], [0], [0]>} : vector<2x4x4xf32>, vector<2x4x256xf32>, vector<2x4x256xf32> -> vector<2x4x256xf32>
    %c0_5 = arith.constant 0 : index
    %13 = memref.load %arg1[%c0_5] : memref<1xf32, #tpu.memory_space<smem>>
    %14 = vector.broadcast %13 : f32 to vector<2x4x256xf32>
    %15 = arith.mulf %14, %12 : vector<2x4x256xf32>
    %c0_6 = arith.constant 0 : index
    %c0_7 = arith.constant 0 : index
    %c0_8 = arith.constant 0 : index
    %16 = vector.load %arg2[%c0_6, %c0_7, %c0_8] : memref<2x4x256xf32, #tpu.memory_space<vmem>>, vector<2x4x256xf32>
    %17 = arith.addf %15, %16 : vector<2x4x256xf32>
    %c0_9 = arith.constant 0 : index
    %c0_10 = arith.constant 0 : index
    %c0_11 = arith.constant 0 : index
    %18 = vector.load %arg3[%c0_9, %c0_10, %c0_11] : memref<2x4x256xf32, #tpu.memory_space<vmem>>, vector<2x4x256xf32>
    tpu.vector_store %arg3[%c0_9, %c0_10, %c0_11], %17 {strides = array<i32>} : memref<2x4x256xf32, #tpu.memory_space<vmem>>, vector<2x4x256xf32>,
    return
  }
  func.func @transform_0(%arg0: i32) -> i32 {
    %c0_i32 = arith.constant 0 : i32
    %c0_i32_0 = arith.constant 0 : i32
    return %c0_i32 : i32
  }
  func.func @transform_1(%arg0: i32) -> (i32, i32, i32) {
    %c0_i32 = arith.constant 0 : i32
    %c0_i32_0 = arith.constant 0 : i32
    %c0_i32_1 = arith.constant 0 : i32
    return %arg0, %c0_i32, %c0_i32_0 : i32, i32, i32
  }
  func.func @transform_2(%arg0: i32) -> (i32, i32, i32) {
    %c0_i32 = arith.constant 0 : i32
    %c0_i32_0 = arith.constant 0 : i32
    %c0_i32_1 = arith.constant 0 : i32
    return %arg0, %c0_i32, %c0_i32_0 : i32, i32, i32
  }
}

</mosaic_0001>

<bundles_post_ra>
// kernel: tpu_custom_call.1
= control target key start
LH: loop header
LB: loop body
LE: loop exit
PB: predicated region body
PF: predicated region fallthrough
CT: control target
= control target key end

     0   :  { %8 = vsyncpa [#allocation4], 0  ;;  %s511_s0 = inlined_call_operand.<no memory space> [shape: f32[1], index: 0, kind: input, shape index: {}]   ;;  %s512_s1 = inlined_call_operand.hbm [shape: f32[2,4,256], index: 1, kind: input, shape index: {}]   ;;  %s513_s2 = inlined_call_operand.hbm [shape: f32[2,4,256], index: 2, kind: output, shape index: {}]  }
   0x1   :  { %9 = vsyncpa [#allocation5], 0  ;;  %s458_s9 = smov [#allocation3]  }
   0x2   :  { %s17_s10 = sshll.u32 %s458_s9, 4  ;;  %s18_s10 = int_to_ptr.vmem [resolvable:$true] %s17_s10 }
   0x3   :  { %s422_s11 = scalar_lea.vmem %s18_s10, 256  ;;  %p427_p1 = scmp.lt.s32.totalorder %s18_s10, %s18_s10 }
   0x4   :  { %p423_p0 = scmp.ne.s32.totalorder %s18_s10, %s422_s11  ;;  %p428_p2 = scmp.lt.s32.totalorder %s422_s11, %s422_s11 }
   0x6   :  { %p429_p3 = por %p428_p2, %p427_p1 }
   0x8   :  { %p430_p4 = pnand %p429_p3, %p423_p0 }
   0xa   :  { %433 = shalt.err (!%p430_p4)
}
   0xb   :  { %s459_s12 = smov 128   ;;  %s460_s13 = smov 8  }
   0xc   :  { %23 = dma.hbm_to_vmem [thread:$0]  %s512_s1, 256, %s18_s10, [#allocation4], %s459_s12, %s459_s12, %s460_s13  }
   0xd   :  { %454 = dma.done.wait [#allocation4], 256  }
   0xe   :  { %455 = vsyncadd [#allocation4], 4294967040  ;;  %v27_v0 = vld [vmem:[#allocation3] sm:$0xff]  ;;  %v484_v1 = vld [vmem:[#allocation3 + $0x8] sm:$0xff]  ;;  %vm175_vm0 = vcmask 27648   ;;  %vm202_vm1 = vcmask 1043456   ;;  %v357_v27 = vstv %s511_s0 }
   0xf   :  { %v30_v2 = vcombine.high %v27_v0, %v27_v0  ;;  %v488_v3 = vcombine.high %v484_v1, %v484_v1  ;;  %v461_v20 = vmov 0.0   ;;  %vm198_vm2 = vcmask 31744   ;;  %s462_s17 = smov [#allocation6]  }
  0x10   :  { %s381_s18 = sshll.u32 %s462_s17, 4  ;;  %s382_s18 = int_to_ptr.vmem [resolvable:$true] %s381_s18 }
  0x11   :  { %62 = vmatprep.subr.mxu0 %v30_v2  ;;  %135 = vmatprep.subr.mxu1 %v488_v3  ;;  %s434_s0 = scalar_lea.vmem %s382_s18, 256  ;;  %p439_p6 = scmp.lt.s32.totalorder %s382_s18, %s382_s18 }
  0x12   :  { %63 = vmatpush1.xpose.msra.mxu0 %v27_v0  ;;  %96 = vmatprep.mubr.f32.mxu0 %v30_v2  ;;  %p435_p5 = scmp.ne.s32.totalorder %s382_s18, %s434_s0  ;;  %p440_p7 = scmp.lt.s32.totalorder %s434_s0, %s434_s0 }
  0x13   :  { %136 = vmatpush1.xpose.msra.mxu1 %v484_v1  ;;  %169 = vmatprep.mubr.f32.mxu1 %v488_v3 }
  0x14   :  { %393 = vmatprep.subr.msk.mxu0 %vm202_vm1, %v30_v2  ;;  %396 = vmatprep.subr.msk.mxu1 %vm202_vm1, %v488_v3  ;;  %p441_p8 = por %p440_p7, %p439_p6 }
  0x15   :  { %97 = vmatmul.mubr.f32.vlgmr.msra.gmra.mxu0 %v27_v0 }
  0x16   :  { %170 = vmatmul.mubr.f32.vlgmr.msra.gmra.mxu1 %v484_v1  ;;  %271 = vmatprep.mubr.f32.mxu0 %v461_v20  ;;  %p442_p9 = pnand %p441_p8, %p435_p5 }
  0x17   :  { %394 = vmatpush1.msk.msra.mxu0 %vm202_vm1, %v27_v0  ;;  %397 = vmatpush1.msk.msra.mxu1 %vm202_vm1, %v484_v1 }
  0x18   :  { %349 = vmatprep.mubr.f32.mxu1 %v461_v20 }
  0xd5   :  { %v98_v4 = vpop.f32.mrf.mxu0 }
  0xd6   :  { %v171_v5 = vpop.f32.mrf.mxu1  ;;  %v176_v6 = vsel %vm175_vm0, %v98_v4, inf }
  0xd7   :  { %177 = vmin.xlane.f32.xlu0 %v176_v6  ;;  %v100_v7 = vpop.f32.mrf.mxu0  ;;  %v179_v9 = vsel %vm175_vm0, %v171_v5, inf }
  0xd8   :  { %v173_v8 = vpop.f32.mrf.mxu1 }
  0xdb   :  { %180 = vmin.xlane.f32.xlu0 %v179_v9 }
 0x160   :  { %v178_v10 = vpop.xlane.xlu0 %177 }
 0x161   :  { %v182_v11 = vsub.f32 %v178_v10, %v98_v4 }
 0x163   :  { %v184_v12 = vmul.f32 1.442695, %v182_v11 }
 0x164   :  { %v181_v13 = vpop.xlane.xlu0 %180 }
 0x165   :  { %406 = vpow2.f32 %v184_v12  ;;  %v183_v14 = vsub.f32 %v181_v13, %v171_v5 }
 0x167   :  { %v186_v15 = vmul.f32 1.442695, %v183_v14 }
 0x169   :  { %408 = vpow2.f32 %v186_v15 }
 0x172   :  { %v407_v16 = vpop.eup %406 }
 0x173   :  { %v188_v17 = vsel %vm175_vm0, %v407_v16, 0.0 }
 0x174   :  { %189 = vadd.xlane.f32.xlu1 %v188_v17 }
 0x176   :  { %v409_v18 = vpop.eup %408 }
 0x177   :  { %v191_v19 = vsel %vm175_vm0, %v409_v18, 0.0 }
 0x178   :  { %192 = vadd.xlane.f32.xlu1 %v191_v19 }
 0x1fd   :  { %v190_v21 = vpop.xlane.xlu1 %189 }
 0x1fe   :  { %410 = vrcp.f32 %v190_v21 }
 0x201   :  { %v193_v22 = vpop.xlane.xlu1 %192 }
 0x202   :  { %412 = vrcp.f32 %v193_v22 }
 0x20b   :  { %v411_v23 = vpop.eup %410 }
 0x20c   :  { %v196_v24 = vmul.f32 %v411_v23, %v407_v16 }
 0x20e   :  { %395 = vmatmul.mubr.msk.f32.vlgmr.msra.gmra.mxu0 %vm198_vm2, %v196_v24 }
 0x20f   :  { %v413_v25 = vpop.eup %412 }
 0x210   :  { %v197_v26 = vmul.f32 %v413_v25, %v409_v18 }
 0x212   :  { %398 = vmatmul.mubr.msk.f32.vlgmr.msra.gmra.mxu1 %vm198_vm2, %v197_v26 }
 0x2ce   :  { %v273_v28 = vpop.f32.mrf.mxu0 }
 0x2cf   :  { %v358_v29 = vmul.f32 %v357_v27, %v273_v28 }
 0x2d0   :  { %v275_v30 = vpop.f32.mrf.mxu0 }
 0x2d1   :  { %v359_v31 = vmul.f32 %v357_v27, %v275_v30  ;;  %v362_v33 = vadd.f32 %v358_v29, %v27_v0 }
 0x2d2   :  { %v351_v32 = vpop.f32.mrf.mxu1 }
 0x2d3   :  { %v363_v34 = vadd.f32 %v359_v31, %v30_v2  ;;  %v360_v35 = vmul.f32 %v357_v27, %v351_v32 }
 0x2d4   :  { %v353_v36 = vpop.f32.mrf.mxu1 }
 0x2d5   :  { %v370_v37 = vcombine.low %v362_v33, %v363_v34  ;;  %v361_v38 = vmul.f32 %v357_v27, %v353_v36  ;;  %v364_v39 = vadd.f32 %v360_v35, %v484_v1 }
 0x2d7   :  { %374 = vst [vmem:[#allocation6] sm:$0xff] %v370_v37  ;;  %v365_v40 = vadd.f32 %v361_v38, %v488_v3 }
 0x2d9   :  { %v371_v41 = vcombine.low %v364_v39, %v365_v40 }
 0x2db   :  { %375 = vst [vmem:[#allocation6 + $0x8] sm:$0xff] %v371_v41 }
 0x2dc   :  { %445 = shalt.err (!%p442_p9)
}
 0x2dd   :  { %387 = dma.vmem_to_hbm [thread:$0]  %s382_s18, 256, %s513_s2, [#allocation5], %s459_s12, %s459_s12, %s460_s13  }
 0x2de   :  { %456 = dma.done.wait [#allocation5], 256  }
 0x2df   :  { %457 = vsyncadd [#allocation5], 4294967040 }
 0x2e0   :  { %391 = vsyncpa [#allocation4], 1 }
 0x2e1   :  { %392 = vsyncpa [#allocation5], 1 }

</bundles_post_ra>
